<compile_context>
chip_gen: v7x
topology: tpu7x:2x2x1
jax: 0.10.0
libtpu: 0.0.40
codegen_flags: <defaults>
</compile_context>

<pallas_src>
import functools

import jax
import jax.numpy as jnp
import numpy as np
from jax.experimental import pallas as pl
from jax.experimental.pallas import tpu as pltpu

# Contractions narrower than this stay on the VPU (broadcast-FMA); wider ones use
# the MXU.  With batch packing the packed contractions (G*Cin, G*hidden) clear
# this threshold, putting both 1x1 convs on the otherwise-idle MXU (v6e/v7x win).
_MXU_MIN_CONTRACT = 8


def _round_up(x, m):
    return ((x + m - 1) // m) * m


# ----------------------------------------------------------------------------
# Fused kernel
# ----------------------------------------------------------------------------
def _fused_inverted_residual_kernel(
    x_ref, w1_ref, b1_ref, wdw_ref, b2_ref, w3_ref, b3_ref, col_ref,
    o_ref, ypad_ref, *, H, W, K, stride, use_res, LPAD):
    """One packed batch group (G images) per grid step.

    x_ref   : (1, G*Cin, H*W)          channels (packed over G images) on sublanes
    w1_ref  : (G*hidden, G*Cin)        block-diag expand 1x1 weights (BN1 folded)
    b1_ref  : (G*hidden, 1)
    wdw_ref : (G*hidden, K*K)          depthwise weights (BN2 folded, tiled over G)
    b2_ref  : (G*hidden, 1)
    w3_ref  : (G*oup, G*hidden)        block-diag project 1x1 weights (BN3 folded)
    b3_ref  : (G*oup, 1)
    col_ref : (1, H*W) int32           column index of every flattened pixel
    o_ref   : (1, G*oup, Ho*Wo)
    ypad_ref: (G*hidden, LPAD + H*W + RPAD) VMEM scratch with zero halo,
              128-lane-aligned central region.
    """
    Cp = x_ref.shape[1]                 # packed input channels (G*Cin)
    Hp = w1_ref.shape[0]                # packed hidden channels (G*hidden)
    HW = H * W
    p = K // 2
    RPAD = ypad_ref.shape[1] - LPAD - HW

    # Zero the halo regions (aligned, full-region stores).  Re-done each step so
    # correctness does not depend on which grid step a megacore core starts on.
    ypad_ref[:, :LPAD] = jnp.zeros((Hp, LPAD), jnp.float32)
    ypad_ref[:, LPAD + HW:] = jnp.zeros((Hp, RPAD), jnp.float32)

    x = x_ref[0].astype(jnp.float32)                      # (Cp, HW)

    # ---------------- Stage 1: expand 1x1 conv (+BN1) + relu6 ----------------
    w1 = w1_ref[...]                                      # (Hp, Cp)
    b1 = b1_ref[...]                                      # (Hp, 1)
    if Cp >= _MXU_MIN_CONTRACT:
        y1 = jnp.dot(w1, x, preferred_element_type=jnp.float32)
    else:
        # VPU broadcast-FMA fallback for tiny contractions (e.g. unpacked v5e).
        y1 = w1[:, 0:1] * x[0:1, :]
        for c in range(1, Cp):
            y1 = y1 + w1[:, c:c + 1] * x[c:c + 1, :]
    y1 = jnp.clip(y1 + b1, 0.0, 6.0)                      # (Hp, HW)

    # ------------- Stage 2: depthwise KxK conv (+BN2) + relu6 ----------------
    # Scratch layout: [ LPAD zeros | y1 (flattened H*W) | RPAD zeros ].
    # The store below is lane-aligned (LPAD % 128 == 0) and unmasked.
    # A tap at (dh, dw) is the contiguous lane slice starting at
    # LPAD + (dh-p)*W + (dw-p); vertical out-of-image reads land in the zero
    # halo; horizontal cross-row leakage is removed with a per-dw column mask
    # applied once to the partial sum over dh.
    ypad_ref[:, LPAD:LPAD + HW] = y1

    wdw = wdw_ref[...]                                    # (Hp, K*K)
    b2 = b2_ref[...]                                      # (Hp, 1)
    col = col_ref[...]                                    # (1, HW) int32

    acc = None
    for dw in range(K):
        part = None
        for dh in range(K):
            off = LPAD + (dh - p) * W + (dw - p)          # static python int >= 0
            tap = ypad_ref[:, off:off + HW]               # (Hp, HW)
            ti = dh * K + dw
            contrib = wdw[:, ti:ti + 1] * tap
            part = contrib if part is None else part + contrib
        if dw != p:
            valid = (col >= (p - dw)) & (col < (W + p - dw))
            part = jnp.where(valid, part, 0.0)
        acc = part if acc is None else acc + part
    y2 = jnp.clip(acc + b2, 0.0, 6.0)                     # (Hp, HW)  (stride-1 grid)

    if stride != 1:
        # Subsample the stride-1 grid with strided lane loads from the scratch
        # (no (HW, HWo) selection matmul).
        Ho = (H + 2 * p - K) // stride + 1
        Wo = (W + 2 * p - K) // stride + 1
        ypad_ref[:, LPAD:LPAD + HW] = y2                  # aligned store, reuse scratch
        rows = []
        for io in range(Ho):
            start = LPAD + io * stride * W                # static python int
            rows.append(ypad_ref[:, pl.ds(start, Wo, stride=stride)])
        y2 = jnp.concatenate(rows, axis=-1)               # (Hp, Ho*Wo)
        # TODO(synk): Wo-wide pieces are lane-sparse; for production strides use a
        #             phase-split layout instead of per-row concatenation.

    # ----------- Stage 3: project 1x1 conv (+BN3) (+ residual) ---------------
    w3 = w3_ref[...]                                      # (G*oup, Hp)
    b3 = b3_ref[...]                                      # (G*oup, 1)
    if Hp >= _MXU_MIN_CONTRACT:
        out = jnp.dot(w3, y2, preferred_element_type=jnp.float32)
    else:
        out = w3[:, 0:1] * y2[0:1, :]
        for h in range(1, Hp):
            out = out + w3[:, h:h + 1] * y2[h:h + 1, :]
    out = out + b3
    if use_res:
        out = out + x                                     # input block already resident
    o_ref[0] = out.astype(o_ref.dtype)


# ----------------------------------------------------------------------------
# Wrapper
# ----------------------------------------------------------------------------
def _fold_bn(conv_w2d, bn, eps=1e-5):
    """Fold BN (running stats) into conv weights. conv_w2d: (Cout, fan_in)."""
    gamma, beta, mean, var = bn
    s = gamma / jnp.sqrt(var + eps)
    w = (conv_w2d * s[:, None]).astype(jnp.float32)
    b = (beta - mean * s)[:, None].astype(jnp.float32)    # (Cout, 1)
    return w, b


def inverted_residual_forward(x_nchw, params, *, kernel_size, stride, inp, oup):
    """Forward pass of InvertedResidual. Input/output are NCHW (PyTorch layout)."""
    assert stride in (1, 2)
    assert kernel_size % 2 == 1, "odd kernel_size assumed (padding = K // 2)"
    N, Cin, H, W = x_nchw.shape
    assert Cin == inp
    K = kernel_size
    p = K // 2
    hidden = params["w1"].shape[0]
    use_res = (stride == 1) and (inp == oup)
    Ho = (H + 2 * p - K) // stride + 1
    Wo = (W + 2 * p - K) // stride + 1
    HW = H * W
    PAD = p * W + p
    LPAD = _round_up(PAD, 128)          # aligned left halo -> unmasked y1 store
    RPAD = _round_up(PAD, 128)

    # Batch packing factor: pack G images' channels into one sublane group.
    G = 1
    if Cin <= 8 and 8 % Cin == 0:
        G = 8 // Cin
    while G > 1 and N % G != 0:
        G -= 1

    # Fold BN into the conv weights (eval-mode semantics), then block-diagonalize
    # / tile them over the packed batch group.
    w1f, b1 = _fold_bn(params["w1"], params["bn1"])                       # (hidden, inp)
    wdwf, b2 = _fold_bn(params["w_dw"].reshape(hidden, K * K), params["bn2"])
    w3f, b3 = _fold_bn(params["w3"], params["bn3"])                       # (oup, hidden)
    if G > 1:
        eye = jnp.eye(G, dtype=jnp.float32)
        w1f = jnp.kron(eye, w1f)                       # (G*hidden, G*inp)
        w3f = jnp.kron(eye, w3f)                       # (G*oup,    G*hidden)
        wdwf = jnp.tile(wdwf, (G, 1))                  # (G*hidden, K*K)
        b1 = jnp.tile(b1, (G, 1))
        b2 = jnp.tile(b2, (G, 1))
        b3 = jnp.tile(b3, (G, 1))

    Cp = G * Cin
    Hp = G * hidden
    Op = G * oup

    # Packed, NCHW-native, free HBM reshape: G images' channels on sublanes,
    # flat H*W on lanes.  No dtype up-cast in HBM (kernel casts in VMEM).
    x3 = x_nchw.reshape(N // G, Cp, HW)
    col_map = jnp.broadcast_to(jnp.arange(W, dtype=jnp.int32),
                               (H, W)).reshape(1, HW)

    kernel = functools.partial(_fused_inverted_residual_kernel,
                               H=H, W=W, K=K, stride=stride,
                               use_res=use_res, LPAD=LPAD)

    out = pl.pallas_call(
        kernel,
        out_shape=jax.ShapeDtypeStruct((N // G, Op, Ho * Wo), x_nchw.dtype),
        grid=(N // G,),
        in_specs=[
            pl.BlockSpec((1, Cp, HW), lambda n: (n, 0, 0)),
            pl.BlockSpec((Hp, Cp), lambda n: (0, 0)),
            pl.BlockSpec((Hp, 1), lambda n: (0, 0)),
            pl.BlockSpec((Hp, K * K), lambda n: (0, 0)),
            pl.BlockSpec((Hp, 1), lambda n: (0, 0)),
            pl.BlockSpec((Op, Hp), lambda n: (0, 0)),
            pl.BlockSpec((Op, 1), lambda n: (0, 0)),
            pl.BlockSpec((1, HW), lambda n: (0, 0)),
        ],
        out_specs=pl.BlockSpec((1, Op, Ho * Wo), lambda n: (n, 0, 0)),
        scratch_shapes=[pltpu.VMEM((Hp, LPAD + HW + RPAD), jnp.float32)],
        compiler_params=pltpu.CompilerParams(
            dimension_semantics=("parallel",)),
    )(x3, w1f, b1, wdwf, b2, w3f, b3, col_map)

    return out.reshape(N, oup, Ho, Wo)


# ----------------------------------------------------------------------------
# Reference (plain JAX, NCHW) for verification
# ----------------------------------------------------------------------------
def reference_forward(x_nchw, params, *, kernel_size, stride, inp, oup):
    K = kernel_size
    p = K // 2
    use_res = (stride == 1) and (inp == oup)
    hidden = params["w1"].shape[0]
    x = x_nchw.astype(jnp.float32)

    def bn(y, bnp):
        g, b, m, v = bnp
        s = g / jnp.sqrt(v + 1e-5)
        return y * s[None, :, None, None] + (b - m * s)[None, :, None, None]

    dn = ("NCHW", "OIHW", "NCHW")
    hp = jax.lax.Precision.HIGHEST
    y = jax.lax.conv_general_dilated(
        x, params["w1"].reshape(hidden, inp, 1, 1), (1, 1), "VALID",
        dimension_numbers=dn, precision=hp)
    y = jnp.clip(bn(y, params["bn1"]), 0.0, 6.0)
    y = jax.lax.conv_general_dilated(
        y, params["w_dw"].reshape(hidden, 1, K, K), (stride, stride),
        [(p, p), (p, p)], dimension_numbers=dn,
        feature_group_count=hidden, precision=hp)
    y = jnp.clip(bn(y, params["bn2"]), 0.0, 6.0)
    y = jax.lax.conv_general_dilated(
        y, params["w3"].reshape(oup, hidden, 1, 1), (1, 1), "VALID",
        dimension_numbers=dn, precision=hp)
    y = bn(y, params["bn3"])
    if use_res:
        y = y + x
    return y


# ----------------------------------------------------------------------------
# Main
# ----------------------------------------------------------------------------
if __name__ == "__main__":
    # Module config (consistent with InvertedResidual.__init__)
    inp, oup = 4, 4
    kernel_size, stride, expand_ratio = 3, 1, 3
    hidden = round(inp * expand_ratio)  # 12
    N, H, W = 2, 16, 16

    key = jax.random.PRNGKey(0)
    ks = jax.random.split(key, 8)

    def bn_params(k, c):
        k1, k2, k3, k4 = jax.random.split(k, 4)
        gamma = jax.random.uniform(k1, (c,), jnp.float32, 0.5, 1.5)
        beta = jax.random.normal(k2, (c,), jnp.float32) * 0.1
        mean = jax.random.normal(k3, (c,), jnp.float32) * 0.1
        var = jax.random.uniform(k4, (c,), jnp.float32, 0.5, 1.5)
        return (gamma, beta, mean, var)

    params = {
        # PyTorch conv1.weight is (hidden, inp, 1, 1)  -> store as (hidden, inp)
        "w1": jax.random.normal(ks[0], (hidden, inp), jnp.float32) * 0.3,
        "bn1": bn_params(ks[1], hidden),
        # PyTorch conv2.weight is (hidden, 1, K, K)    -> store as (hidden, K, K)
        "w_dw": jax.random.normal(ks[2], (hidden, kernel_size, kernel_size),
                                  jnp.float32) * 0.3,
        "bn2": bn_params(ks[3], hidden),
        # PyTorch conv3.weight is (oup, hidden, 1, 1)  -> store as (oup, hidden)
        "w3": jax.random.normal(ks[4], (oup, hidden), jnp.float32) * 0.3,
        "bn3": bn_params(ks[5], oup),
    }

    x = jax.random.normal(ks[6], (N, inp, H, W), jnp.float32)  # NCHW, PyTorch-style

    out = inverted_residual_forward(
        x, params, kernel_size=kernel_size, stride=stride, inp=inp, oup=oup)
    out = jax.block_until_ready(out)

    ref = reference_forward(
        x, params, kernel_size=kernel_size, stride=stride, inp=inp, oup=oup)
    ref = jax.block_until_ready(ref)

    assert out.shape == (N, oup, H, W), out.shape
    np.testing.assert_allclose(np.asarray(out), np.asarray(ref),
                               rtol=5e-4, atol=5e-4)
    print("KERNEL_OK")
</pallas_src>

<mosaic_0001>
module attributes {stable_mosaic.version = 11 : i64} {
  func.func @_fused_inverted_residual_kernel(%arg0: i32, %arg1: memref<1x8x256xf32, #tpu.memory_space<vmem>>, %arg2: memref<24x8xf32, #tpu.memory_space<vmem>>, %arg3: memref<24x1xf32, #tpu.memory_space<vmem>>, %arg4: memref<24x9xf32, #tpu.memory_space<vmem>>, %arg5: memref<24x1xf32, #tpu.memory_space<vmem>>, %arg6: memref<8x24xf32, #tpu.memory_space<vmem>>, %arg7: memref<8x1xf32, #tpu.memory_space<vmem>>, %arg8: memref<1x256xi32, #tpu.memory_space<vmem>>, %arg9: memref<1x8x256xf32, #tpu.memory_space<vmem>>, %arg10: memref<24x512xf32, #tpu.memory_space<vmem>>) attributes {dimension_semantics = [#tpu.dimension_semantics<parallel>], iteration_bounds = array<i64: 1>, scalar_prefetch = 0 : i64, scratch_operands = 1 : i64, tpu.core_type = #tpu.core_type<tc>, window_params = [{transform_indices = @transform_0, window_bounds = array<i64: 1, 8, 256>}, {pipeline_mode = #tpu.pipeline_mode<synchronous>, transform_indices = @transform_1, window_bounds = array<i64: 24, 8>}, {pipeline_mode = #tpu.pipeline_mode<synchronous>, transform_indices = @transform_2, window_bounds = array<i64: 24, 1>}, {pipeline_mode = #tpu.pipeline_mode<synchronous>, transform_indices = @transform_3, window_bounds = array<i64: 24, 9>}, {pipeline_mode = #tpu.pipeline_mode<synchronous>, transform_indices = @transform_4, window_bounds = array<i64: 24, 1>}, {pipeline_mode = #tpu.pipeline_mode<synchronous>, transform_indices = @transform_5, window_bounds = array<i64: 8, 24>}, {pipeline_mode = #tpu.pipeline_mode<synchronous>, transform_indices = @transform_6, window_bounds = array<i64: 8, 1>}, {pipeline_mode = #tpu.pipeline_mode<synchronous>, transform_indices = @transform_7, window_bounds = array<i64: 1, 256>}, {transform_indices = @transform_8, window_bounds = array<i64: 1, 8, 256>}]} {
    %cst = arith.constant 0.000000e+00 : f32
    %0 = vector.broadcast %cst : f32 to vector<24x128xf32>
    %c0 = arith.constant 0 : index
    %c0_0 = arith.constant 0 : index
    %1 = vector.load %arg10[%c0, %c0_0] : memref<24x512xf32, #tpu.memory_space<vmem>>, vector<24x128xf32>
    tpu.vector_store %arg10[%c0, %c0_0], %0 {strides = array<i32>} : memref<24x512xf32, #tpu.memory_space<vmem>>, vector<24x128xf32>,
    %cst_1 = arith.constant 0.000000e+00 : f32
    %2 = vector.broadcast %cst_1 : f32 to vector<24x128xf32>
    %c0_2 = arith.constant 0 : index
    %c384 = arith.constant 384 : index
    %3 = vector.load %arg10[%c0_2, %c384] : memref<24x512xf32, #tpu.memory_space<vmem>>, vector<24x128xf32>
    tpu.vector_store %arg10[%c0_2, %c384], %2 {strides = array<i32>} : memref<24x512xf32, #tpu.memory_space<vmem>>, vector<24x128xf32>,
    %c0_3 = arith.constant 0 : index
    %c0_4 = arith.constant 0 : index
    %c0_5 = arith.constant 0 : index
    %4 = vector.load %arg1[%c0_3, %c0_4, %c0_5] : memref<1x8x256xf32, #tpu.memory_space<vmem>>, vector<1x8x256xf32>
    %5 = vector.shape_cast %4 : vector<1x8x256xf32> to vector<8x256xf32>
    %c0_6 = arith.constant 0 : index
    %c0_7 = arith.constant 0 : index
    %6 = vector.load %arg2[%c0_6, %c0_7] : memref<24x8xf32, #tpu.memory_space<vmem>>, vector<24x8xf32>
    %c0_8 = arith.constant 0 : index
    %c0_9 = arith.constant 0 : index
    %7 = vector.load %arg3[%c0_8, %c0_9] : memref<24x1xf32, #tpu.memory_space<vmem>>, vector<24x1xf32>
    %cst_10 = arith.constant dense<0.000000e+00> : vector<24x256xf32>
    %8 = tpu.matmul %6, %5, %cst_10 {dimension_numbers = #tpu.dot_dimension_numbers<[1], [0], [0], [1], [0, 0, 1, 1], [], []>} : vector<24x8xf32>, vector<8x256xf32>, vector<24x256xf32> -> vector<24x256xf32>
    %9 = vector.broadcast %7 : vector<24x1xf32> to vector<24x256xf32>
    %10 = arith.addf %8, %9 : vector<24x256xf32>
    %cst_11 = arith.constant 0.000000e+00 : f32
    %cst_12 = arith.constant 6.000000e+00 : f32
    %11 = vector.broadcast %cst_11 : f32 to vector<24x256xf32>
    %12 = arith.maximumf %11, %10 : vector<24x256xf32>
    %13 = vector.broadcast %cst_12 : f32 to vector<24x256xf32>
    %14 = arith.minimumf %13, %12 : vector<24x256xf32>
    %c0_13 = arith.constant 0 : index
    %c128 = arith.constant 128 : index
    %15 = vector.load %arg10[%c0_13, %c128] : memref<24x512xf32, #tpu.memory_space<vmem>>, vector<24x256xf32>
    tpu.vector_store %arg10[%c0_13, %c128], %14 {strides = array<i32>} : memref<24x512xf32, #tpu.memory_space<vmem>>, vector<24x256xf32>,
    %c0_14 = arith.constant 0 : index
    %c0_15 = arith.constant 0 : index
    %16 = vector.load %arg4[%c0_14, %c0_15] : memref<24x9xf32, #tpu.memory_space<vmem>>, vector<24x9xf32>
    %c0_16 = arith.constant 0 : index
    %c0_17 = arith.constant 0 : index
    %17 = vector.load %arg5[%c0_16, %c0_17] : memref<24x1xf32, #tpu.memory_space<vmem>>, vector<24x1xf32>
    %c0_18 = arith.constant 0 : index
    %c0_19 = arith.constant 0 : index
    %18 = vector.load %arg8[%c0_18, %c0_19] : memref<1x256xi32, #tpu.memory_space<vmem>>, vector<1x256xi32>
    %c0_20 = arith.constant 0 : index
    %c111 = arith.constant 111 : index
    %19 = vector.load %arg10[%c0_20, %c111] : memref<24x512xf32, #tpu.memory_space<vmem>>, vector<24x256xf32>
    %20 = vector.extract_strided_slice %16 {offsets = [0, 0], sizes = [24, 1], strides = [1, 1]} : vector<24x9xf32> to vector<24x1xf32>
    %21 = vector.broadcast %20 : vector<24x1xf32> to vector<24x256xf32>
    %22 = arith.mulf %21, %19 : vector<24x256xf32>
    %c0_21 = arith.constant 0 : index
    %c127 = arith.constant 127 : index
    %23 = vector.load %arg10[%c0_21, %c127] : memref<24x512xf32, #tpu.memory_space<vmem>>, vector<24x256xf32>
    %24 = vector.extract_strided_slice %16 {offsets = [0, 3], sizes = [24, 1], strides = [1, 1]} : vector<24x9xf32> to vector<24x1xf32>
    %25 = vector.broadcast %24 : vector<24x1xf32> to vector<24x256xf32>
    %26 = arith.mulf %25, %23 : vector<24x256xf32>
    %27 = arith.addf %22, %26 : vector<24x256xf32>
    %c0_22 = arith.constant 0 : index
    %c143 = arith.constant 143 : index
    %28 = vector.load %arg10[%c0_22, %c143] : memref<24x512xf32, #tpu.memory_space<vmem>>, vector<24x256xf32>
    %29 = vector.extract_strided_slice %16 {offsets = [0, 6], sizes = [24, 1], strides = [1, 1]} : vector<24x9xf32> to vector<24x1xf32>
    %30 = vector.broadcast %29 : vector<24x1xf32> to vector<24x256xf32>
    %31 = arith.mulf %30, %28 : vector<24x256xf32>
    %32 = arith.addf %27, %31 : vector<24x256xf32>
    %c1_i32 = arith.constant 1 : i32
    %33 = vector.broadcast %c1_i32 : i32 to vector<1x256xi32>
    %34 = arith.cmpi sge, %18, %33 : vector<1x256xi32>
    %c17_i32 = arith.constant 17 : i32
    %35 = vector.broadcast %c17_i32 : i32 to vector<1x256xi32>
    %36 = arith.cmpi slt, %18, %35 : vector<1x256xi32>
    %37 = arith.andi %34, %36 : vector<1x256xi1>
    %cst_23 = arith.constant 0.000000e+00 : f32
    %38 = vector.shape_cast %37 : vector<1x256xi1> to vector<1x256xi1>
    %39 = vector.broadcast %38 : vector<1x256xi1> to vector<24x256xi1>
    %40 = vector.broadcast %cst_23 : f32 to vector<24x256xf32>
    %41 = arith.select %39, %32, %40 : vector<24x256xi1>, vector<24x256xf32>
    %c0_24 = arith.constant 0 : index
    %c112 = arith.constant 112 : index
    %42 = vector.load %arg10[%c0_24, %c112] : memref<24x512xf32, #tpu.memory_space<vmem>>, vector<24x256xf32>
    %43 = vector.extract_strided_slice %16 {offsets = [0, 1], sizes = [24, 1], strides = [1, 1]} : vector<24x9xf32> to vector<24x1xf32>
    %44 = vector.broadcast %43 : vector<24x1xf32> to vector<24x256xf32>
    %45 = arith.mulf %44, %42 : vector<24x256xf32>
    %c0_25 = arith.constant 0 : index
    %c128_26 = arith.constant 128 : index
    %46 = vector.load %arg10[%c0_25, %c128_26] : memref<24x512xf32, #tpu.memory_space<vmem>>, vector<24x256xf32>
    %47 = vector.extract_strided_slice %16 {offsets = [0, 4], sizes = [24, 1], strides = [1, 1]} : vector<24x9xf32> to vector<24x1xf32>
    %48 = vector.broadcast %47 : vector<24x1xf32> to vector<24x256xf32>
    %49 = arith.mulf %48, %46 : vector<24x256xf32>
    %50 = arith.addf %45, %49 : vector<24x256xf32>
    %c0_27 = arith.constant 0 : index
    %c144 = arith.constant 144 : index
    %51 = vector.load %arg10[%c0_27, %c144] : memref<24x512xf32, #tpu.memory_space<vmem>>, vector<24x256xf32>
    %52 = vector.extract_strided_slice %16 {offsets = [0, 7], sizes = [24, 1], strides = [1, 1]} : vector<24x9xf32> to vector<24x1xf32>
    %53 = vector.broadcast %52 : vector<24x1xf32> to vector<24x256xf32>
    %54 = arith.mulf %53, %51 : vector<24x256xf32>
    %55 = arith.addf %50, %54 : vector<24x256xf32>
    %56 = arith.addf %41, %55 : vector<24x256xf32>
    %c0_28 = arith.constant 0 : index
    %c113 = arith.constant 113 : index
    %57 = vector.load %arg10[%c0_28, %c113] : memref<24x512xf32, #tpu.memory_space<vmem>>, vector<24x256xf32>
    %58 = vector.extract_strided_slice %16 {offsets = [0, 2], sizes = [24, 1], strides = [1, 1]} : vector<24x9xf32> to vector<24x1xf32>
    %59 = vector.broadcast %58 : vector<24x1xf32> to vector<24x256xf32>
    %60 = arith.mulf %59, %57 : vector<24x256xf32>
    %c0_29 = arith.constant 0 : index
    %c129 = arith.constant 129 : index
    %61 = vector.load %arg10[%c0_29, %c129] : memref<24x512xf32, #tpu.memory_space<vmem>>, vector<24x256xf32>
    %62 = vector.extract_strided_slice %16 {offsets = [0, 5], sizes = [24, 1], strides = [1, 1]} : vector<24x9xf32> to vector<24x1xf32>
    %63 = vector.broadcast %62 : vector<24x1xf32> to vector<24x256xf32>
    %64 = arith.mulf %63, %61 : vector<24x256xf32>
    %65 = arith.addf %60, %64 : vector<24x256xf32>
    %c0_30 = arith.constant 0 : index
    %c145 = arith.constant 145 : index
    %66 = vector.load %arg10[%c0_30, %c145] : memref<24x512xf32, #tpu.memory_space<vmem>>, vector<24x256xf32>
    %67 = vector.extract_strided_slice %16 {offsets = [0, 8], sizes = [24, 1], strides = [1, 1]} : vector<24x9xf32> to vector<24x1xf32>
    %68 = vector.broadcast %67 : vector<24x1xf32> to vector<24x256xf32>
    %69 = arith.mulf %68, %66 : vector<24x256xf32>
    %70 = arith.addf %65, %69 : vector<24x256xf32>
    %c-1_i32 = arith.constant -1 : i32
    %71 = vector.broadcast %c-1_i32 : i32 to vector<1x256xi32>
    %72 = arith.cmpi sge, %18, %71 : vector<1x256xi32>
    %c15_i32 = arith.constant 15 : i32
    %73 = vector.broadcast %c15_i32 : i32 to vector<1x256xi32>
    %74 = arith.cmpi slt, %18, %73 : vector<1x256xi32>
    %75 = arith.andi %72, %74 : vector<1x256xi1>
    %cst_31 = arith.constant 0.000000e+00 : f32
    %76 = vector.shape_cast %75 : vector<1x256xi1> to vector<1x256xi1>
    %77 = vector.broadcast %76 : vector<1x256xi1> to vector<24x256xi1>
    %78 = vector.broadcast %cst_31 : f32 to vector<24x256xf32>
    %79 = arith.select %77, %70, %78 : vector<24x256xi1>, vector<24x256xf32>
    %80 = arith.addf %56, %79 : vector<24x256xf32>
    %81 = vector.broadcast %17 : vector<24x1xf32> to vector<24x256xf32>
    %82 = arith.addf %80, %81 : vector<24x256xf32>
    %cst_32 = arith.constant 0.000000e+00 : f32
    %cst_33 = arith.constant 6.000000e+00 : f32
    %83 = vector.broadcast %cst_32 : f32 to vector<24x256xf32>
    %84 = arith.maximumf %83, %82 : vector<24x256xf32>
    %85 = vector.broadcast %cst_33 : f32 to vector<24x256xf32>
    %86 = arith.minimumf %85, %84 : vector<24x256xf32>
    %c0_34 = arith.constant 0 : index
    %c0_35 = arith.constant 0 : index
    %87 = vector.load %arg6[%c0_34, %c0_35] : memref<8x24xf32, #tpu.memory_space<vmem>>, vector<8x24xf32>
    %c0_36 = arith.constant 0 : index
    %c0_37 = arith.constant 0 : index
    %88 = vector.load %arg7[%c0_36, %c0_37] : memref<8x1xf32, #tpu.memory_space<vmem>>, vector<8x1xf32>
    %cst_38 = arith.constant dense<0.000000e+00> : vector<8x256xf32>
    %89 = tpu.matmul %87, %86, %cst_38 {dimension_numbers = #tpu.dot_dimension_numbers<[1], [0], [0], [1], [0, 0, 1, 1], [], []>} : vector<8x24xf32>, vector<24x256xf32>, vector<8x256xf32> -> vector<8x256xf32>
    %90 = vector.broadcast %88 : vector<8x1xf32> to vector<8x256xf32>
    %91 = arith.addf %89, %90 : vector<8x256xf32>
    %92 = arith.addf %91, %5 : vector<8x256xf32>
    %c0_39 = arith.constant 0 : index
    %c0_40 = arith.constant 0 : index
    %c0_41 = arith.constant 0 : index
    %93 = vector.load %arg9[%c0_39, %c0_40, %c0_41] : memref<1x8x256xf32, #tpu.memory_space<vmem>>, vector<1x8x256xf32>
    %94 = vector.shape_cast %93 : vector<1x8x256xf32> to vector<8x256xf32>
    %95 = vector.shape_cast %92 : vector<8x256xf32> to vector<1x8x256xf32>
    tpu.vector_store %arg9[%c0_39, %c0_40, %c0_41], %95 {strides = array<i32>} : memref<1x8x256xf32, #tpu.memory_space<vmem>>, vector<1x8x256xf32>,
    return
  }
  func.func @transform_0(%arg0: i32) -> (i32, i32, i32) {
    %c0_i32 = arith.constant 0 : i32
    %c0_i32_0 = arith.constant 0 : i32
    %c0_i32_1 = arith.constant 0 : i32
    return %arg0, %c0_i32, %c0_i32_0 : i32, i32, i32
  }
  func.func @transform_1(%arg0: i32) -> (i32, i32) {
    %c0_i32 = arith.constant 0 : i32
    %c0_i32_0 = arith.constant 0 : i32
    %c0_i32_1 = arith.constant 0 : i32
    return %c0_i32, %c0_i32_0 : i32, i32
  }
  func.func @transform_2(%arg0: i32) -> (i32, i32) {
    %c0_i32 = arith.constant 0 : i32
    %c0_i32_0 = arith.constant 0 : i32
    %c0_i32_1 = arith.constant 0 : i32
    return %c0_i32, %c0_i32_0 : i32, i32
  }
  func.func @transform_3(%arg0: i32) -> (i32, i32) {
    %c0_i32 = arith.constant 0 : i32
    %c0_i32_0 = arith.constant 0 : i32
    %c0_i32_1 = arith.constant 0 : i32
    return %c0_i32, %c0_i32_0 : i32, i32
  }
  func.func @transform_4(%arg0: i32) -> (i32, i32) {
    %c0_i32 = arith.constant 0 : i32
    %c0_i32_0 = arith.constant 0 : i32
    %c0_i32_1 = arith.constant 0 : i32
    return %c0_i32, %c0_i32_0 : i32, i32
  }
  func.func @transform_5(%arg0: i32) -> (i32, i32) {
    %c0_i32 = arith.constant 0 : i32
    %c0_i32_0 = arith.constant 0 : i32
    %c0_i32_1 = arith.constant 0 : i32
    return %c0_i32, %c0_i32_0 : i32, i32
  }
  func.func @transform_6(%arg0: i32) -> (i32, i32) {
    %c0_i32 = arith.constant 0 : i32
    %c0_i32_0 = arith.constant 0 : i32
    %c0_i32_1 = arith.constant 0 : i32
    return %c0_i32, %c0_i32_0 : i32, i32
  }
  func.func @transform_7(%arg0: i32) -> (i32, i32) {
    %c0_i32 = arith.constant 0 : i32
    %c0_i32_0 = arith.constant 0 : i32
    %c0_i32_1 = arith.constant 0 : i32
    return %c0_i32, %c0_i32_0 : i32, i32
  }
  func.func @transform_8(%arg0: i32) -> (i32, i32, i32) {
    %c0_i32 = arith.constant 0 : i32
    %c0_i32_0 = arith.constant 0 : i32
    %c0_i32_1 = arith.constant 0 : i32
    return %arg0, %c0_i32, %c0_i32_0 : i32, i32, i32
  }
}

</mosaic_0001>

<bundles_post_ra>
// kernel: tpu_custom_call.1
= control target key start
LH: loop header
LB: loop body
LE: loop exit
PB: predicated region body
PF: predicated region fallthrough
CT: control target
= control target key end

     0   :  { %vm59_vm0 = vcmask 64512   ;;  %v1059_v3 = vmov 0.0   ;;  %v1060_v5 = vmov 0   ;;  %s1650_s0 = inlined_call_operand.vmem [shape: f32[1,8,256], index: 0, kind: input, shape index: {}]   ;;  %s1651_s1 = inlined_call_operand.vmem [shape: f32[24,8], index: 1, kind: input, shape index: {}]   ;;  %s1652_s2 = inlined_call_operand.vmem [shape: f32[24,1], index: 2, kind: input, shape index: {}]   ;;  %s1653_s3 = inlined_call_operand.vmem [shape: f32[24,9], index: 3, kind: input, shape index: {}]   ;;  %s1654_s4 = inlined_call_operand.vmem [shape: f32[24,1], index: 4, kind: input, shape index: {}]   ;;  %s1655_s5 = inlined_call_operand.vmem [shape: f32[8,24], index: 5, kind: input, shape index: {}]   ;;  %s1656_s6 = inlined_call_operand.vmem [shape: f32[8,1], index: 6, kind: input, shape index: {}]   ;;  %s1657_s7 = inlined_call_operand.vmem [shape: s32[1,256], index: 7, kind: input, shape index: {}]   ;;  %s1658_s8 = inlined_call_operand.hbm [shape: f32[1,8,256], index: 8, kind: output, shape index: {}]  }
   0x1   :  { %v37_v0 = vld [vmem:[%s1650_s0 + $0x8] sm:$0xff]  ;;  %v36_v1 = vld [vmem:[%s1650_s0] sm:$0xff]  ;;  %133 = vmatprep.mubr.f32.mxu0 %v1059_v3  ;;  %v43_v4 = vld [vmem:[%s1652_s2 + $0x10] sm:$0xff]  ;;  %1009 = vset.pattern.permute.xlu1 %v1060_v5 }
   0x2   :  { %v38_v2 = vld [vmem:[%s1651_s1] sm:$0xff]  ;;  %69 = vmatprep.subr.mxu0 %v37_v0  ;;  %56 = vperm.xlu1 %1009, %v43_v4  }
   0x3   :  { %70 = vmatpush1.msra.mxu0 %v36_v1 }
   0x4   :  { %985 = vmatmul.mubr.msk.f32.vlgmr.msra.gmra.mrb[0].mxu0 %vm59_vm0, %v38_v2 }
   0x5   :  { %13 = vsyncpa [#allocation4], 0  ;;  %139 = vmatprep.mubr.f32.mxu0 %v1059_v3  ;;  %v39_v6 = vld [vmem:[%s1651_s1 + $0x8] sm:$0xff]  ;;  %v1061_v8 = vmov 3   ;;  %v170_v9 = vld [vmem:[%s1653_s3] sm:$0xff]  ;;  %960 = vmatprep.mubr.f32.mxu1 %v1059_v3  ;;  %v1062_v11 = vmov 6  }
   0x6   :  { %v1140_v7 = vld [vmem:[%s1653_s3 + $0x8] sm:$0xff]  ;;  %1011 = vset.pattern.permute.xlu0 %v1061_v8  ;;  %1010 = vset.pattern.permute.xlu1 %v1061_v8  ;;  %v40_v10 = vld [vmem:[%s1651_s1 + $0x10] sm:$0xff]  ;;  %v1063_v12 = vmov 4   ;;  %v1064_v13 = vmov 5   ;;  %v1065_v14 = vmov 8   ;;  %v1066_v16 = vmov 7  }
   0x7   :  { %215 = vperm.xlu0 %1011, %v1140_v7   ;;  %211 = vperm.xlu1 %1010, %v170_v9   ;;  %v172_v15 = vld [vmem:[%s1653_s3 + $0x10] sm:$0xff]  ;;  %v1067_v17 = vmov 1   ;;  %v1068_v18 = vmov 2   ;;  %v41_v19 = vld [vmem:[%s1652_s2] sm:$0xff]  ;;  %v42_v20 = vld [vmem:[%s1652_s2 + $0x8] sm:$0xff]  ;;  %s1069_s2 = smov 112  }
   0x8   :  { %986 = vmatmul.mubr.msk.f32.gmra.mrb[2].mxu0 %vm59_vm0, %v39_v6  ;;  %s1070_s25 = smov 96   ;;  %vm340_vm1 = vcmask 785408   ;;  %vm258_vm2 = vcmask 916480   ;;  %s1072_s10 = smov 17   ;;  %vm406_vm9 = vcmask 138240   ;;  %vm827_vm11 = vcmask 121856  }
   0x9   :  { %145 = vmatprep.mubr.f32.mxu0 %v1059_v3  ;;  %s1073_s11 = smov 15   ;;  %vm602_vm13 = vcmask 130048   ;;  %s1074_s16 = smov [#allocation3]  }
   0xa   :  { %s977_s17 = sshll.u32 %s1074_s16, 4  ;;  %s978_s17 = int_to_ptr.vmem [resolvable:$true] %s977_s17 }
   0xb   :  { %1013 = vset.pattern.permute.xlu0 %v1062_v11  ;;  %1012 = vset.pattern.permute.xlu1 %v1063_v12  ;;  %p1040_p1 = scmp.lt.s32.totalorder %s978_s17, %s978_s17 }
   0xc   :  { %293 = vperm.xlu0 %1013, %v170_v9   ;;  %987 = vmatmul.mubr.msk.f32.gmra.mrb[4].mxu0 %vm59_vm0, %v40_v10  ;;  %vm892_vm0 = vcmask 195584  }
   0xd   :  { %447 = vperm.xlu1 %1012, %v170_v9  }
  0x10   :  { %1016 = vset.pattern.permute.xlu0 %v1064_v13 }
  0x11   :  { %647 = vperm.xlu0 %1016, %v1140_v7   ;;  %451 = vperm.xlu1 %1012, %v1140_v7  }
  0x15   :  { %1018 = vset.pattern.permute.xlu0 %v1065_v14  ;;  %1014 = vset.pattern.permute.xlu1 %v1062_v11 }
  0x16   :  { %715 = vperm.xlu0 %1018, %v170_v9   ;;  %297 = vperm.xlu1 %1014, %v1140_v7  }
  0x1a   :  { %1021 = vset.pattern.permute.xlu0 %v1063_v12  ;;  %1015 = vset.pattern.permute.xlu1 %v1064_v13 }
  0x1b   :  { %455 = vperm.xlu0 %1021, %v172_v15   ;;  %643 = vperm.xlu1 %1015, %v170_v9  }
  0x1f   :  { %1024 = vset.pattern.permute.xlu0 %v1066_v16  ;;  %1017 = vset.pattern.permute.xlu1 %v1066_v16 }
  0x20   :  { %512 = vperm.xlu0 %1024, %v172_v15   ;;  %504 = vperm.xlu1 %1017, %v170_v9  }
  0x24   :  { %1030 = vset.pattern.permute.xlu0 %v1067_v17  ;;  %508 = vperm.xlu1 %1017, %v1140_v7  }
  0x25   :  { %434 = vperm.xlu0 %1030, %v172_v15  }
  0x28   :  { %1019 = vset.pattern.permute.xlu1 %v1065_v14 }
  0x29   :  { %1031 = vset.pattern.permute.xlu0 %v1068_v18  ;;  %719 = vperm.xlu1 %1019, %v1140_v7  }
  0x2a   :  { %622 = vperm.xlu0 %1031, %v170_v9  }
  0x2d   :  { %1020 = vset.pattern.permute.xlu1 %v1061_v8 }
  0x2e   :  { %630 = vperm.xlu0 %1031, %v172_v15   ;;  %219 = vperm.xlu1 %1020, %v172_v15  }
  0x32   :  { %1032 = vset.pattern.permute.xlu0 %v1060_v5  ;;  %1022 = vset.pattern.permute.xlu1 %v1062_v11 }
  0x33   :  { %46 = vperm.xlu0 %1032, %v41_v19   ;;  %301 = vperm.xlu1 %1022, %v172_v15  }
  0x37   :  { %51 = vperm.xlu0 %1032, %v42_v20   ;;  %1023 = vset.pattern.permute.xlu1 %v1064_v13 }
  0x38   :  { %651 = vperm.xlu1 %1023, %v172_v15  }
  0x3b   :  { %193 = vperm.xlu0 %1032, %v1140_v7  }
  0x3c   :  { %1025 = vset.pattern.permute.xlu1 %v1065_v14 }
  0x3d   :  { %723 = vperm.xlu1 %1025, %v172_v15  }
  0x41   :  { %1026 = vset.pattern.permute.xlu1 %v1060_v5 }
  0x42   :  { %188 = vperm.xlu1 %1026, %v170_v9  }
  0x46   :  { %1027 = vset.pattern.permute.xlu1 %v1067_v17 }
  0x47   :  { %426 = vperm.xlu1 %1027, %v170_v9  }
  0x4b   :  { %430 = vperm.xlu1 %1027, %v1140_v7  }
  0x4f   :  { %1028 = vset.pattern.permute.xlu1 %v1068_v18 }
  0x50   :  { %626 = vperm.xlu1 %1028, %v1140_v7  }
  0x54   :  { %1029 = vset.pattern.permute.xlu1 %v1060_v5 }
  0x55   :  { %198 = vperm.xlu1 %1029, %v172_v15  }
  0x81   :  { %v1171_v21 = vpop.permute.xlu1 %56 }
  0x86   :  { %v1173_v22 = vpop.permute.xlu0 %215  ;;  %v1175_v23 = vpop.permute.xlu1 %211 }
  0x87   :  { %v222_v24 = vmul.f32 0.0, %v1175_v23  ;;  %v225_v26 = vmul.f32 0.0, %v1173_v22 }
  0x89   :  { %240 = vrot.lane.b32.xlu1 %v222_v24, %s1069_s2 }
  0x8b   :  { %v1178_v25 = vpop.permute.xlu0 %293 }
  0x8c   :  { %v306_v27 = vmul.f32 0.0, %v1178_v25  ;;  %v1183_v28 = vpop.permute.xlu1 %447 }
  0x8d   :  { %246 = vrot.lane.b32.xlu1 %v225_v26, %s1069_s2 }
  0x8e   :  { %326 = vrot.lane.b32.xlu0 %v306_v27, %s1070_s25 }
  0x90   :  { %v1187_v29 = vpop.permute.xlu1 %451  ;;  %v1191_v31 = vpop.permute.xlu0 %647 }
  0x91   :  { %v659_v33 = vmul.f32 0.0, %v1191_v31 }
  0x95   :  { %v1189_v30 = vpop.permute.xlu1 %297  ;;  %v1204_v38 = vpop.permute.xlu0 %715 }
  0x96   :  { %v309_v32 = vmul.f32 0.0, %v1189_v30  ;;  %v728_v39 = vmul.f32 0.0, %v1204_v38 }
  0x98   :  { %332 = vrot.lane.b32.xlu1 %v309_v32, %s1070_s25 }
  0x9a   :  { %v1196_v34 = vpop.permute.xlu1 %643  ;;  %v1219_v45 = vpop.permute.xlu0 %455 }
  0x9b   :  { %v656_v35 = vmul.f32 0.0, %v1196_v34 }
  0x9c   :  { %682 = vrot.lane.b32.xlu1 %v659_v33, %s1069_s2 }
  0x9d   :  { %676 = vrot.lane.b32.xlu0 %v656_v35, %s1069_s2 }
  0x9f   :  { %v1201_v36 = vpop.permute.xlu1 %504  ;;  %v1226_v49 = vpop.permute.xlu0 %512 }
  0xa0   :  { %v517_v37 = vmul.f32 0.0, %v1201_v36  ;;  %v523_v50 = vmul.f32 0.0, %v1226_v49 }
  0xa2   :  { %537 = vrot.lane.b32.xlu0 %v517_v37, %s1070_s25 }
  0xa3   :  { %v1208_v40 = vpop.permute.xlu1 %508 }
  0xa4   :  { %v520_v41 = vmul.f32 0.0, %v1208_v40  ;;  %v1235_v53 = vpop.permute.xlu0 %434 }
  0xa6   :  { %543 = vrot.lane.b32.xlu1 %v520_v41, %s1070_s25  ;;  %748 = vrot.lane.b32.xlu0 %v728_v39, %s1070_s25 }
  0xa8   :  { %v1213_v42 = vpop.permute.xlu1 %719 }
  0xa9   :  { %v731_v43 = vmul.f32 0.0, %v1213_v42  ;;  %v1239_v55 = vpop.permute.xlu0 %622 }
  0xab   :  { %754 = vrot.lane.b32.xlu1 %v731_v43, %s1070_s25 }
  0xad   :  { %v1217_v44 = vpop.permute.xlu1 %219  ;;  %v1243_v57 = vpop.permute.xlu0 %630 }
  0xae   :  { %v228_v46 = vmul.f32 0.0, %v1217_v44 }
  0xb0   :  { %252 = vrot.lane.b32.xlu0 %v228_v46, %s1069_s2 }
  0xb2   :  { %v1223_v47 = vpop.permute.xlu1 %301  ;;  %v47_v59 = vpop.permute.xlu0 %46 }
  0xb3   :  { %v312_v48 = vmul.f32 0.0, %v1223_v47 }
  0xb5   :  { %338 = vrot.lane.b32.xlu1 %v312_v48, %s1070_s25 }
  0xb6   :  { %v52_v2 = vpop.permute.xlu0 %51 }
  0xb7   :  { %v1230_v51 = vpop.permute.xlu1 %651 }
  0xb8   :  { %v662_v52 = vmul.f32 0.0, %v1230_v51 }
  0xb9   :  { %549 = vrot.lane.b32.xlu1 %v523_v50, %s1070_s25 }
  0xba   :  { %688 = vrot.lane.b32.xlu0 %v662_v52, %s1069_s2 }
  0xbc   :  { %v1237_v54 = vpop.permute.xlu1 %723 }
  0xc1   :  { %v1241_v56 = vpop.permute.xlu1 %188 }
  0xc6   :  { %v1245_v58 = vpop.permute.xlu1 %426 }
  0xca   :  { %v1247_v61 = vpop.permute.xlu1 %430 }
  0xcf   :  { %v1253_v11 = vpop.permute.xlu1 %626 }
  0xd4   :  { %v1295_v46 = vpop.permute.xlu1 %198 }
  0xd7   :  { %v135_v60 = vpop.f32.mrb[0].mxu0 }
  0xd8   :  { %v136_v62 = vadd.f32 %v135_v60, %v47_v59  ;;  %v137_v63 = vpop.f32.mrb[1].mxu0 }
  0xd9   :  { %v138_v0 = vadd.f32 %v137_v63, %v47_v59 }
  0xda   :  { %v152_v1 = vmax.f32 %v136_v62, 0.0 }
  0xdb   :  { %v153_v3 = vmax.f32 %v138_v0, 0.0  ;;  %v141_v4 = vpop.f32.mrb[2].mxu0 }
  0xdc   :  { %v1249_v6 = vmin.f32 %v152_v1, 6.0  ;;  %v142_v7 = vadd.f32 %v141_v4, %v52_v2  ;;  %v143_v8 = vpop.f32.mrb[3].mxu0 }
  0xdd   :  { %v1251_v9 = vmin.f32 %v153_v3, 6.0  ;;  %v144_v10 = vadd.f32 %v143_v8, %v52_v2 }
  0xde   :  { %v1257_v12 = vmul.f32 %v1245_v58, %v1249_v6  ;;  %v154_v13 = vmax.f32 %v142_v7, 0.0  ;;  %v458_v14 = vmul.f32 %v1183_v28, %v1249_v6  ;;  %v223_v15 = vmul.f32 %v1175_v23, %v1249_v6 }
  0xdf   :  { %v1265_v16 = vmul.f32 %v1245_v58, %v1251_v9  ;;  %v155_v17 = vmax.f32 %v144_v10, 0.0  ;;  %v147_v18 = vpop.f32.mrb[4].mxu0  ;;  %v304_v32 = vmul.f32 %v1178_v25, %v1249_v6  ;;  %v224_v39 = vmul.f32 %v1175_v23, %v1251_v9 }
  0xe0   :  { %v1267_v19 = vmin.f32 %v154_v13, 6.0  ;;  %v148_v20 = vadd.f32 %v147_v18, %v1171_v21  ;;  %v149_v24 = vpop.f32.mrb[5].mxu0  ;;  %470 = vrot.lane.b32.xlu0 %v458_v14, %s1069_s2  ;;  %242 = vrot.lane.b32.xlu1 %v223_v15, %s1069_s2  ;;  %v654_v52 = vmul.f32 %v1196_v34, %v1249_v6  ;;  %v459_v59 = vmul.f32 %v1183_v28, %v1251_v9 }
  0xe1   :  { %v1272_v26 = vmin.f32 %v155_v17, 6.0  ;;  %v150_v27 = vadd.f32 %v149_v24, %v1171_v21  ;;  %v515_v62 = vmul.f32 %v1201_v36, %v1249_v6  ;;  %v305_v63 = vmul.f32 %v1178_v25, %v1251_v9 }
  0xe2   :  { %v1279_v33 = vmul.f32 %v1247_v61, %v1267_v19  ;;  %v156_v35 = vmax.f32 %v148_v20, 0.0  ;;  %v1283_v37 = vmul.f32 %v1253_v11, %v1267_v19  ;;  %v1325_v28 = vmul.f32 %v1241_v56, %v1249_v6 }
  0xe3   :  { %v1289_v41 = vmul.f32 %v1247_v61, %v1272_v26  ;;  %v157_v21 = vmax.f32 %v150_v27, 0.0  ;;  %v1293_v43 = vmul.f32 %v1253_v11, %v1272_v26  ;;  %v726_v0 = vmul.f32 %v1204_v38, %v1249_v6 }
  0xe4   :  { %v1297_v48 = vmin.f32 %v156_v35, 6.0  ;;  %322 = vrot.lane.b32.xlu0 %v304_v32, %s1070_s25  ;;  %244 = vrot.lane.b32.xlu1 %v224_v39, %s1069_s2  ;;  %v655_v1 = vmul.f32 %v1196_v34, %v1251_v9  ;;  %v226_v25 = vmul.f32 %v1173_v22, %v1267_v19  ;;  %v516_v2 = vmul.f32 %v1201_v36, %v1251_v9  ;;  %v175_v35 = vld [vmem:[%s1654_s4 + $0x10] sm:$0xff] }
  0xe5   :  { %v1301_v50 = vmin.f32 %v157_v21, 6.0  ;;  %v460_v3 = vmul.f32 %v1187_v29, %v1267_v19  ;;  %v727_v34 = vmul.f32 %v1204_v38, %v1251_v9  ;;  %v308_v4 = vmul.f32 %v1189_v30, %v1272_v26  ;;  %v1424_v21 = vpop.permute.xlu0 %193 }
  0xe6   :  { %v1305_v23 = vmul.f32 %v1295_v46, %v1297_v48  ;;  %v307_v36 = vmul.f32 %v1189_v30, %v1267_v19  ;;  %v658_v7 = vmul.f32 %v1191_v31, %v1272_v26  ;;  %v657_v38 = vmul.f32 %v1191_v31, %v1267_v19 }
  0xe7   :  { %v1313_v60 = vmul.f32 %v1295_v46, %v1301_v50  ;;  %v519_v8 = vmul.f32 %v1208_v40, %v1272_v26  ;;  %v518_v30 = vmul.f32 %v1208_v40, %v1267_v19  ;;  %v730_v10 = vmul.f32 %v1213_v42, %v1272_v26 }
  0xe8   :  { %672 = vrot.lane.b32.xlu0 %v654_v52, %s1069_s2  ;;  %472 = vrot.lane.b32.xlu1 %v459_v59, %s1069_s2  ;;  %v729_v31 = vmul.f32 %v1213_v42, %v1267_v19  ;;  %v229_v13 = vmul.f32 %v1217_v44, %v1297_v48  ;;  %v227_v40 = vmul.f32 %v1173_v22, %v1272_v26  ;;  %v734_v27 = vmul.f32 0.0, %v1237_v54 }
  0xe9   :  { %v660_v14 = vmul.f32 %v1230_v51, %v1297_v48  ;;  %v461_v42 = vmul.f32 %v1187_v29, %v1272_v26  ;;  %v732_v15 = vmul.f32 %v1237_v54, %v1297_v48  ;;  %v462_v22 = vmul.f32 %v1219_v45, %v1297_v48 }
  0xea   :  { %v463_v17 = vmul.f32 %v1219_v45, %v1301_v50  ;;  %v310_v29 = vmul.f32 %v1223_v47, %v1297_v48  ;;  %v311_v18 = vmul.f32 %v1223_v47, %v1301_v50  ;;  %v521_v20 = vmul.f32 %v1226_v49, %v1297_v48 }
  0xeb   :  { %v522_v45 = vmul.f32 %v1226_v49, %v1301_v50  ;;  %v230_v24 = vmul.f32 %v1217_v44, %v1301_v50  ;;  %v661_v47 = vmul.f32 %v1230_v51, %v1301_v50  ;;  %v174_v49 = vld [vmem:[%s1654_s4 + $0x8] sm:$0xff]  ;;  %v733_v44 = vmul.f32 %v1237_v54, %v1301_v50  ;;  %v173_v51 = vld [vmem:[%s1654_s4] sm:$0xff]  ;;  %s1071_s4 = smov 16  }
  0xec   :  { %533 = vrot.lane.b32.xlu0 %v515_v62, %s1070_s25  ;;  %324 = vrot.lane.b32.xlu1 %v305_v63, %s1070_s25 }
  0xf0   :  { %744 = vrot.lane.b32.xlu0 %v726_v0, %s1070_s25  ;;  %674 = vrot.lane.b32.xlu1 %v655_v1, %s1069_s2 }
  0xf4   :  { %248 = vrot.lane.b32.xlu0 %v226_v25, %s1069_s2  ;;  %535 = vrot.lane.b32.xlu1 %v516_v2, %s1070_s25 }
  0xf8   :  { %474 = vrot.lane.b32.xlu0 %v460_v3, %s1069_s2  ;;  %746 = vrot.lane.b32.xlu1 %v727_v34, %s1070_s25 }
  0xfb   :  { %v241_v32 = vpop.permute.xlu1 %240 }
  0xfc   :  { %330 = vrot.lane.b32.xlu0 %v308_v4, %s1070_s25  ;;  %328 = vrot.lane.b32.xlu1 %v307_v36, %s1070_s25 }
  0xff   :  { %v1422_v39 = vpop.permute.xlu1 %246 }
 0x100   :  { %680 = vrot.lane.b32.xlu0 %v658_v7, %s1069_s2  ;;  %678 = vrot.lane.b32.xlu1 %v657_v38, %s1069_s2  ;;  %v327_v54 = vpop.permute.xlu0 %326 }
 0x104   :  { %541 = vrot.lane.b32.xlu0 %v519_v8, %s1070_s25  ;;  %539 = vrot.lane.b32.xlu1 %v518_v30, %s1070_s25 }
 0x108   :  { %752 = vrot.lane.b32.xlu0 %v730_v10, %s1070_s25  ;;  %750 = vrot.lane.b32.xlu1 %v729_v31, %s1070_s25  ;;  %v437_v31 = vmul.f32 0.0, %v1245_v58 }
 0x10a   :  { %v1426_v52 = vpop.permute.xlu1 %332 }
 0x10c   :  { %254 = vrot.lane.b32.xlu0 %v229_v13, %s1069_s2  ;;  %250 = vrot.lane.b32.xlu1 %v227_v40, %s1069_s2  ;;  %v203_v13 = vmul.f32 %v1241_v56, %v1251_v9 }
 0x10e   :  { %v1428_v59 = vpop.permute.xlu1 %682 }
 0x10f   :  { %v677_v62 = vpop.permute.xlu0 %676 }
 0x110   :  { %684 = vrot.lane.b32.xlu0 %v660_v14, %s1069_s2  ;;  %476 = vrot.lane.b32.xlu1 %v461_v42, %s1069_s2 }
 0x114   :  { %756 = vrot.lane.b32.xlu0 %v732_v15, %s1070_s25  ;;  %478 = vrot.lane.b32.xlu1 %v462_v22, %s1069_s2  ;;  %v538_v0 = vpop.permute.xlu0 %537  ;;  %v633_v22 = vmul.f32 0.0, %v1239_v55 }
 0x118   :  { %480 = vrot.lane.b32.xlu0 %v463_v17, %s1069_s2  ;;  %334 = vrot.lane.b32.xlu1 %v310_v29, %s1070_s25  ;;  %v1430_v63 = vpop.permute.xlu1 %543  ;;  %v749_v25 = vpop.permute.xlu0 %748 }
 0x11c   :  { %336 = vrot.lane.b32.xlu0 %v311_v18, %s1070_s25  ;;  %545 = vrot.lane.b32.xlu1 %v521_v20, %s1070_s25 }
 0x11d   :  { %v1432_v1 = vpop.permute.xlu1 %754 }
 0x120   :  { %547 = vrot.lane.b32.xlu0 %v522_v45, %s1070_s25  ;;  %256 = vrot.lane.b32.xlu1 %v230_v24, %s1069_s2  ;;  %v201_v45 = vmul.f32 0.0, %v1241_v56 }
 0x122   :  { %v1436_v3 = vpop.permute.xlu0 %252 }
 0x124   :  { %760 = vrot.lane.b32.xlu0 %v734_v27, %s1070_s25  ;;  %686 = vrot.lane.b32.xlu1 %v661_v47, %s1069_s2 }
 0x127   :  { %v1434_v2 = vpop.permute.xlu1 %338 }
 0x128   :  { %859 = vperm.xlu0 %1032, %v174_v49   ;;  %758 = vrot.lane.b32.xlu1 %v733_v44, %s1070_s25 }
 0x12b   :  { %v1440_v4 = vpop.permute.xlu1 %549 }
 0x12c   :  { %864 = vperm.xlu0 %1032, %v175_v35   ;;  %854 = vperm.xlu1 %1029, %v173_v51   ;;  %v1438_v34 = vpop.permute.xlu0 %688 }
 0x152   :  { %v471_v36 = vpop.permute.xlu0 %470  ;;  %v243_v7 = vpop.permute.xlu1 %242 }
 0x153   :  { %v494_v40 = vadd.f32 %v471_v36, %v437_v31  ;;  %v259_v18 = vsel %vm258_vm2, %v241_v32, %v243_v7 }
 0x154   :  { %v274_v47 = vadd.f32 %v259_v18, %v201_v45 }
 0x156   :  { %v323_v38 = vpop.permute.xlu0 %322  ;;  %v245_v8 = vpop.permute.xlu1 %244 }
 0x157   :  { %v276_v14 = vadd.f32 %v245_v8, %v203_v13  ;;  %v356_v51 = vadd.f32 %v323_v38, %v274_v47 }
 0x15a   :  { %v673_v30 = vpop.permute.xlu0 %672  ;;  %v473_v10 = vpop.permute.xlu1 %472 }
 0x15b   :  { %v705_v58 = vadd.f32 %v673_v30, %v633_v22  ;;  %v482_v44 = vsel %vm258_vm2, %v471_v36, %v473_v10  ;;  %v496_v32 = vadd.f32 %v473_v10, %v1265_v16 }
 0x15e   :  { %v534_v42 = vpop.permute.xlu0 %533  ;;  %v325_v15 = vpop.permute.xlu1 %324 }
 0x15f   :  { %v566_v17 = vadd.f32 %v534_v42, %v494_v40  ;;  %v342_v29 = vsel %vm340_vm1, %v325_v15, %v327_v54  ;;  %v260_v54 = vsel %vm258_vm2, %v243_v7, %v245_v8  ;;  %v341_v22 = vsel %vm340_vm1, %v323_v38, %v325_v15 }
 0x160   :  { %v358_v20 = vadd.f32 %v342_v29, %v276_v14  ;;  %v495_v14 = vadd.f32 %v482_v44, %v1257_v12  ;;  %v275_v36 = vadd.f32 %v260_v54, %v1325_v28  ;;  %v635_v12 = vmul.f32 %v1239_v55, %v1251_v9 }
 0x161   :  { %584 = vrot.lane.b32.xlu0 %v566_v17, %s1071_s4  ;;  %v205_v54 = vmul.f32 %v1424_v21, %v1267_v19 }
 0x162   :  { %v745_v24 = vpop.permute.xlu0 %744  ;;  %392 = vrot.lane.b32.xlu1 %v358_v20, %s1072_s10  ;;  %v675_v27 = vpop.permute.xlu1 %674 }
 0x163   :  { %v777_v49 = vadd.f32 %v745_v24, %v705_v58  ;;  %v690_v16 = vsel %vm258_vm2, %v673_v30, %v675_v27  ;;  %v691_v7 = vsel %vm258_vm2, %v675_v27, %v677_v62 }
 0x164   :  { %v707_v30 = vadd.f32 %v691_v7, %v635_v12 }
 0x165   :  { %809 = vrot.lane.b32.xlu0 %v777_v49, %s1073_s11 }
 0x166   :  { %v249_v35 = vpop.permute.xlu0 %248  ;;  %v536_v56 = vpop.permute.xlu1 %535 }
 0x167   :  { %v552_v31 = vsel %vm340_vm1, %v536_v56, %v538_v0  ;;  %v551_v13 = vsel %vm340_vm1, %v534_v42, %v536_v56  ;;  %v634_v0 = vmul.f32 %v1239_v55, %v1249_v6  ;;  %v357_v42 = vadd.f32 %v341_v22, %v275_v36 }
 0x168   :  { %v568_v40 = vadd.f32 %v552_v31, %v496_v32  ;;  %v567_v8 = vadd.f32 %v551_v13, %v495_v14  ;;  %v440_v55 = vmul.f32 0.0, %v1247_v61  ;;  %v206_v56 = vmul.f32 %v1424_v21, %v1272_v26 }
 0x169   :  { %388 = vrot.lane.b32.xlu0 %v356_v51, %s1072_s10  ;;  %v706_v15 = vadd.f32 %v690_v16, %v634_v0  ;;  %v207_v51 = vmul.f32 0.0, %v1295_v46  ;;  %v261_v14 = vsel %vm258_vm2, %v1422_v39, %v249_v35  ;;  %v204_v46 = vmul.f32 0.0, %v1424_v21 }
 0x16a   :  { %v475_v10 = vpop.permute.xlu0 %474  ;;  %588 = vrot.lane.b32.xlu1 %v568_v40, %s1071_s4  ;;  %v747_v17 = vpop.permute.xlu1 %746 }
 0x16b   :  { %v762_v38 = vsel %vm340_vm1, %v745_v24, %v747_v17  ;;  %v763_v28 = vsel %vm340_vm1, %v747_v17, %v749_v25  ;;  %v497_v9 = vadd.f32 %v475_v10, %v440_v55  ;;  %v636_v24 = vmul.f32 0.0, %v1253_v11 }
 0x16c   :  { %v778_v6 = vadd.f32 %v762_v38, %v706_v15  ;;  %v779_v20 = vadd.f32 %v763_v28, %v707_v30  ;;  %v277_v7 = vadd.f32 %v261_v14, %v204_v46 }
 0x16d   :  { %586 = vrot.lane.b32.xlu0 %v567_v8, %s1071_s4 }
 0x16e   :  { %v331_v29 = vpop.permute.xlu0 %330  ;;  %v329_v18 = vpop.permute.xlu1 %328  ;;  %390 = vrot.lane.b32.xlu1 %v357_v42, %s1072_s10 }
 0x16f   :  { %v344_v22 = vsel %vm340_vm1, %v331_v29, %v1426_v52  ;;  %v343_v16 = vsel %vm340_vm1, %v329_v18, %v331_v29  ;;  %v359_v52 = vadd.f32 %v329_v18, %v277_v7 }
 0x171   :  { %811 = vrot.lane.b32.xlu0 %v778_v6, %s1073_s11 }
 0x172   :  { %v681_v62 = vpop.permute.xlu0 %680  ;;  %v679_v45 = vpop.permute.xlu1 %678  ;;  %813 = vrot.lane.b32.xlu1 %v779_v20, %s1073_s11 }
 0x173   :  { %v708_v47 = vadd.f32 %v679_v45, %v636_v24 }
 0x176   :  { %v542_v58 = vpop.permute.xlu0 %541  ;;  %v540_v25 = vpop.permute.xlu1 %539 }
 0x177   :  { %v569_v27 = vadd.f32 %v540_v25, %v497_v9  ;;  %v553_v21 = vsel %vm340_vm1, %v540_v25, %v542_v58  ;;  %v554_v30 = vsel %vm340_vm1, %v542_v58, %v1430_v63 }
 0x179   :  { %590 = vrot.lane.b32.xlu1 %v569_v27, %s1071_s4 }
 0x17a   :  { %v753_v49 = vpop.permute.xlu0 %752  ;;  %v751_v44 = vpop.permute.xlu1 %750 }
 0x17b   :  { %v780_v32 = vadd.f32 %v751_v44, %v708_v47  ;;  %v764_v28 = vsel %vm340_vm1, %v751_v44, %v753_v49 }
 0x17d   :  { %815 = vrot.lane.b32.xlu1 %v780_v32, %s1073_s11 }
 0x17e   :  { %v255_v61 = vpop.permute.xlu0 %254  ;;  %v251_v31 = vpop.permute.xlu1 %250 }
 0x17f   :  { %v263_v11 = vsel %vm258_vm2, %v1436_v3, %v255_v61  ;;  %v262_v13 = vsel %vm258_vm2, %v249_v35, %v251_v31  ;;  %v279_v40 = vadd.f32 %v251_v31, %v206_v56  ;;  %v692_v35 = vsel %vm258_vm2, %v679_v45, %v681_v62 }
 0x180   :  { %v280_v26 = vadd.f32 %v263_v11, %v207_v51  ;;  %v278_v36 = vadd.f32 %v262_v13, %v205_v54  ;;  %v443_v45 = vmul.f32 0.0, %v1235_v53  ;;  %v444_v51 = vmul.f32 %v1235_v53, %v1297_v48 }
 0x181   :  { %v361_v19 = vadd.f32 %v344_v22, %v279_v40 }
 0x182   :  { %v1492_v17 = vpop.permute.xlu0 %684  ;;  %v477_v0 = vpop.permute.xlu1 %476  ;;  %v360_v3 = vadd.f32 %v343_v16, %v278_v36 }
 0x183   :  { %v483_v8 = vsel %vm258_vm2, %v475_v10, %v477_v0  ;;  %398 = vrot.lane.b32.xlu1 %v361_v19, %s1072_s10  ;;  %v499_v42 = vadd.f32 %v477_v0, %v1289_v41  ;;  %v709_v10 = vadd.f32 %v692_v35, %v1283_v37  ;;  %v765_v41 = vsel %vm340_vm1, %v753_v49, %v1432_v1 }
 0x184   :  { %v498_v39 = vadd.f32 %v483_v8, %v1279_v33  ;;  %396 = vrot.lane.b32.xlu0 %v360_v3, %s1072_s10  ;;  %v693_v33 = vsel %vm258_vm2, %v681_v62, %v1428_v59  ;;  %v445_v1 = vmul.f32 %v1235_v53, %v1301_v50  ;;  %v640_v53 = vmul.f32 %v1243_v57, %v1297_v48  ;;  %v886_v3 = vld [vmem:[%s1656_s6] sm:$0xff] }
 0x185   :  { %v571_v29 = vadd.f32 %v554_v30, %v499_v42  ;;  %v781_v18 = vadd.f32 %v764_v28, %v709_v10  ;;  %v710_v55 = vadd.f32 %v693_v33, %v1293_v43  ;;  %v639_v0 = vmul.f32 0.0, %v1243_v57 }
 0x186   :  { %v1501_v12 = vpop.permute.xlu0 %756  ;;  %v479_v38 = vpop.permute.xlu1 %478  ;;  %v570_v15 = vadd.f32 %v553_v21, %v498_v39 }
 0x187   :  { %394 = vrot.lane.b32.xlu1 %v359_v52, %s1072_s10  ;;  %v782_v37 = vadd.f32 %v765_v41, %v710_v55  ;;  %v500_v59 = vadd.f32 %v479_v38, %v443_v45 }
 0x188   :  { %592 = vrot.lane.b32.xlu0 %v570_v15, %s1071_s4  ;;  %v369_v15 = vlaneseq }
 0x18a   :  { %v481_v6 = vpop.permute.xlu0 %480  ;;  %v335_v20 = vpop.permute.xlu1 %334  ;;  %v370_v33 = vshrl.u32 %v369_v15, 7 }
 0x18b   :  { %594 = vrot.lane.b32.xlu1 %v571_v29, %s1071_s4  ;;  %v362_v58 = vadd.f32 %v335_v20, %v280_v26  ;;  %v502_v25 = vadd.f32 %v481_v6, %v445_v1  ;;  %v484_v44 = vsel %vm258_vm2, %v479_v38, %v481_v6  ;;  %v176_v38 = vld [vmem:[%s1657_s7] sm:$0x3] }
 0x18c   :  { %817 = vrot.lane.b32.xlu0 %v781_v18, %s1073_s11  ;;  %vm365_vm3 = vcmp.ge.s32.totalorder %v176_v38, 1  ;;  %vm366_vm4 = vcmp.lt.s32.totalorder %v176_v38, 17  ;;  %vm786_vm6 = vcmp.ge.s32.totalorder %v176_v38, 4294967295  ;;  %vm787_vm7 = vcmp.lt.s32.totalorder %v176_v38, 15 }
 0x18d   :  { %vm367_vm5 = vmand %vm365_vm3, %vm366_vm4  ;;  %v371_v29 = vsub.s32 0, %v370_v33  ;;  %v375_v18 = vsub.s32 1, %v370_v33 }
 0x18e   :  { %v337_v63 = vpop.permute.xlu0 %336  ;;  %v546_v62 = vpop.permute.xlu1 %545  ;;  %v368_v41 = vsel %vm367_vm5, 1, %v1060_v5  ;;  %vm788_vm8 = vmand %vm786_vm6, %vm787_vm7 }
 0x18f   :  { %v572_v9 = vadd.f32 %v546_v62, %v500_v59  ;;  %819 = vrot.lane.b32.xlu1 %v782_v37, %s1073_s11  ;;  %v346_v32 = vsel %vm340_vm1, %v337_v63, %v1434_v2  ;;  %v345_v2 = vsel %vm340_vm1, %v335_v20, %v337_v63  ;;  %v1568_v6 = vrot.slane %v368_v41, %v371_v29 }
 0x190   :  { %v789_v20 = vsel %vm788_vm8, 1, %v1060_v5  ;;  %v1571_v55 = vrot.slane %v368_v41, %v375_v18 }
 0x191   :  { %596 = vrot.lane.b32.xlu0 %v572_v9, %s1071_s4  ;;  %v1573_v59 = vrot.slane %v789_v20, %v375_v18  ;;  %vm377_vm10 = vcmp.eq.s32.totalorder %v1568_v6, 1 }
 0x192   :  { %v548_v24 = vpop.permute.xlu0 %547  ;;  %v257_v43 = vpop.permute.xlu1 %256  ;;  %vm378_vm12 = vcmp.eq.s32.totalorder %v1571_v55, 1 }
 0x193   :  { %v556_v27 = vsel %vm340_vm1, %v548_v24, %v1440_v4  ;;  %v264_v47 = vsel %vm258_vm2, %v255_v61, %v257_v43  ;;  %v282_v49 = vadd.f32 %v257_v43, %v1313_v60  ;;  %400 = vrot.lane.b32.xlu1 %v362_v58, %s1072_s10  ;;  %v555_v4 = vsel %vm340_vm1, %v546_v62, %v548_v24 }
 0x194   :  { %v574_v56 = vadd.f32 %v556_v27, %v502_v25  ;;  %v281_v54 = vadd.f32 %v264_v47, %v1305_v23  ;;  %v501_v61 = vadd.f32 %v484_v44, %v444_v51  ;;  %v641_v23 = vmul.f32 %v1243_v57, %v1301_v50 }
 0x195   :  { %v364_v31 = vadd.f32 %v346_v32, %v282_v49  ;;  %v711_v50 = vadd.f32 %v1492_v17, %v639_v0  ;;  %v1577_v62 = vrot.slane %v789_v20, %v371_v29  ;;  %vm799_vm14 = vcmp.eq.s32.totalorder %v1573_v59, 1  ;;  %v885_v59 = vld [vmem:[%s1655_s5] sm:$0xff]  ;;  %s1035_s5 = scalar_lea.vmem %s978_s17, 256 }
 0x196   :  { %v687_v11 = vpop.permute.xlu1 %686  ;;  %v573_v40 = vadd.f32 %v555_v4, %v501_v61  ;;  %v363_v14 = vadd.f32 %v345_v2, %v281_v54  ;;  %v761_v22 = vpop.permute.xlu0 %760  ;;  %p1036_p0 = scmp.ne.s32.totalorder %s978_s17, %s1035_s5  ;;  %p1041_p2 = scmp.lt.s32.totalorder %s1035_s5, %s1035_s5 }
 0x197   :  { %v694_v60 = vsel %vm258_vm2, %v1492_v17, %v687_v11  ;;  %v695_v13 = vsel %vm258_vm2, %v687_v11, %v1438_v34  ;;  %404 = vrot.lane.b32.xlu0 %v364_v31, %s1072_s10  ;;  %600 = vrot.lane.b32.xlu1 %v574_v56, %s1071_s4  ;;  %v783_v7 = vadd.f32 %v1501_v12, %v711_v50  ;;  %vm798_vm15 = vcmp.eq.s32.totalorder %v1577_v62, 1 }
 0x198   :  { %v712_v26 = vadd.f32 %v694_v60, %v640_v53  ;;  %v713_v36 = vadd.f32 %v695_v13, %v641_v23  ;;  %p1042_p3 = por %p1041_p2, %p1040_p1 }
 0x19a   :  { %v759_v46 = vpop.permute.xlu1 %758  ;;  %p1043_p4 = pnand %p1042_p3, %p1036_p0 }
 0x19b   :  { %v766_v34 = vsel %vm340_vm1, %v1501_v12, %v759_v46  ;;  %v767_v16 = vsel %vm340_vm1, %v759_v46, %v761_v22  ;;  %598 = vrot.lane.b32.xlu0 %v573_v40, %s1071_s4  ;;  %402 = vrot.lane.b32.xlu1 %v363_v14, %s1072_s10 }
 0x19c   :  { %v784_v19 = vadd.f32 %v766_v34, %v712_v26  ;;  %v785_v48 = vadd.f32 %v767_v16, %v713_v36 }
 0x19f   :  { %825 = vrot.lane.b32.xlu0 %v785_v48, %s1073_s11  ;;  %823 = vrot.lane.b32.xlu1 %v784_v19, %s1073_s11 }
 0x1a3   :  { %889 = vperm.xlu0 %1032, %v886_v3   ;;  %821 = vrot.lane.b32.xlu1 %v783_v7, %s1073_s11 }
 0x1a7   :  { %v1558_v8 = vpop.permute.xlu0 %859 }
 0x1ab   :  { %v1560_v39 = vpop.permute.xlu1 %854  ;;  %v1562_v57 = vpop.permute.xlu0 %864 }
 0x1d3   :  { %v585_v52 = vpop.permute.xlu0 %584 }
 0x1d4   :  { %v393_v17 = vpop.permute.xlu1 %392 }
 0x1d7   :  { %v810_v21 = vpop.permute.xlu0 %809 }
 0x1db   :  { %v389_v12 = vpop.permute.xlu0 %388 }
 0x1dc   :  { %v589_v35 = vpop.permute.xlu1 %588 }
 0x1df   :  { %v587_v30 = vpop.permute.xlu0 %586 }
 0x1e0   :  { %v391_v42 = vpop.permute.xlu1 %390  ;;  %v603_v47 = vsel %vm602_vm13, %v585_v52, %v587_v30  ;;  %v604_v32 = vsel %vm602_vm13, %v587_v30, %v589_v35 }
 0x1e1   :  { %v407_v63 = vsel %vm406_vm9, %v389_v12, %v391_v42  ;;  %v408_v1 = vsel %vm406_vm9, %v391_v42, %v393_v17 }
 0x1e2   :  { %v419_v58 = vsel %vm377_vm10, %v407_v63, 0.0  ;;  %v420_v24 = vsel %vm378_vm12, %v408_v1, 0.0 }
 0x1e3   :  { %v812_v37 = vpop.permute.xlu0 %811  ;;  %v615_v56 = vadd.f32 %v603_v47, %v419_v58  ;;  %v616_v54 = vadd.f32 %v604_v32, %v420_v24 }
 0x1e4   :  { %v814_v28 = vpop.permute.xlu1 %813  ;;  %v828_v43 = vsel %vm827_vm11, %v810_v21, %v812_v37 }
 0x1e5   :  { %v829_v25 = vsel %vm827_vm11, %v812_v37, %v814_v28  ;;  %v840_v31 = vsel %vm798_vm15, %v828_v43, 0.0 }
 0x1e6   :  { %v841_v51 = vsel %vm799_vm14, %v829_v25, 0.0  ;;  %v846_v53 = vadd.f32 %v840_v31, %v615_v56 }
 0x1e7   :  { %v847_v60 = vadd.f32 %v841_v51, %v616_v54 }
 0x1e8   :  { %v867_v0 = vadd.f32 %v1560_v39, %v846_v53 }
 0x1e9   :  { %v868_v19 = vadd.f32 %v1560_v39, %v847_v60 }
 0x1ea   :  { %v873_v42 = vmax.f32 %v867_v0, 0.0 }
 0x1eb   :  { %v591_v10 = vpop.permute.xlu1 %590  ;;  %v874_v21 = vmax.f32 %v868_v19, 0.0 }
 0x1ec   :  { %v879_v30 = vmin.f32 %v873_v42, 6.0 }
 0x1ed   :  { %v880_v33 = vmin.f32 %v874_v21, 6.0 }
 0x1ef   :  { %v816_v45 = vpop.permute.xlu1 %815 }
 0x1f5   :  { %v399_v9 = vpop.permute.xlu1 %398 }
 0x1f6   :  { %v397_v5 = vpop.permute.xlu0 %396 }
 0x1f7   :  { %v410_v13 = vsel %vm406_vm9, %v397_v5, %v399_v9 }
 0x1f8   :  { %v422_v26 = vsel %vm378_vm12, %v410_v13, 0.0 }
 0x1f9   :  { %v395_v27 = vpop.permute.xlu1 %394 }
 0x1fa   :  { %v409_v49 = vsel %vm406_vm9, %v395_v27, %v397_v5  ;;  %v593_v44 = vpop.permute.xlu0 %592 }
 0x1fb   :  { %v421_v4 = vsel %vm377_vm10, %v409_v49, 0.0  ;;  %v605_v11 = vsel %vm602_vm13, %v591_v10, %v593_v44 }
 0x1fc   :  { %v617_v23 = vadd.f32 %v605_v11, %v421_v4 }
 0x1fd   :  { %v595_v61 = vpop.permute.xlu1 %594 }
 0x1fe   :  { %v818_v2 = vpop.permute.xlu0 %817  ;;  %v606_v40 = vsel %vm602_vm13, %v593_v44, %v595_v61 }
 0x1ff   :  { %v830_v14 = vsel %vm827_vm11, %v816_v45, %v818_v2  ;;  %v618_v34 = vadd.f32 %v606_v40, %v422_v26 }
 0x200   :  { %v842_v22 = vsel %vm798_vm15, %v830_v14, 0.0 }
 0x201   :  { %v848_v36 = vadd.f32 %v842_v22, %v617_v23  ;;  %v820_v46 = vpop.permute.xlu1 %819 }
 0x202   :  { %v831_v16 = vsel %vm827_vm11, %v818_v2, %v820_v46  ;;  %v1034_v2 = vld [vmem:[%s1650_s0 + $0x8] sm:$0xff] }
 0x203   :  { %v843_v48 = vsel %vm799_vm14, %v831_v16, 0.0  ;;  %v869_v50 = vadd.f32 %v1558_v8, %v848_v36  ;;  %v597_v7 = vpop.permute.xlu0 %596 }
 0x204   :  { %v849_v3 = vadd.f32 %v843_v48, %v618_v34 }
 0x205   :  { %v401_v17 = vpop.permute.xlu1 %400  ;;  %v875_v52 = vmax.f32 %v869_v50, 0.0 }
 0x206   :  { %v870_v35 = vadd.f32 %v1558_v8, %v849_v3 }
 0x207   :  { %v881_v28 = vmin.f32 %v875_v52, 6.0 }
 0x208   :  { %v876_v38 = vmax.f32 %v870_v35, 0.0 }
 0x209   :  { %v405_v15 = vpop.permute.xlu0 %404  ;;  %v601_v12 = vpop.permute.xlu1 %600  ;;  %v991_v18 = vpack.c.bf16 %v881_v28, %v879_v30 }
 0x20a   :  { %v882_v10 = vmin.f32 %v876_v38, 6.0 }
 0x20c   :  { %v989_v29 = vpack.c.bf16 %v882_v10, %v880_v33 }
 0x20d   :  { %v599_v41 = vpop.permute.xlu0 %598  ;;  %v403_v39 = vpop.permute.xlu1 %402 }
 0x20e   :  { %v412_v20 = vsel %vm406_vm9, %v403_v39, %v405_v15  ;;  %990 = vmatprep.subr.bf16.mxu1 %v989_v29  ;;  %v608_v45 = vsel %vm602_vm13, %v599_v41, %v601_v12  ;;  %v411_v37 = vsel %vm406_vm9, %v401_v17, %v403_v39  ;;  %v607_v58 = vsel %vm602_vm13, %v597_v7, %v599_v41 }
 0x20f   :  { %v424_v8 = vsel %vm378_vm12, %v412_v20, 0.0  ;;  %992 = vmatpush1.bf16.msra.mxu1 %v991_v18  ;;  %v423_v25 = vsel %vm377_vm10, %v411_v37, 0.0 }
 0x210   :  { %v620_v1 = vadd.f32 %v608_v45, %v424_v8  ;;  %v619_v55 = vadd.f32 %v607_v58, %v423_v25 }
 0x211   :  { %v826_v63 = vpop.permute.xlu0 %825  ;;  %v824_v9 = vpop.permute.xlu1 %823 }
 0x212   :  { %v833_v5 = vsel %vm827_vm11, %v824_v9, %v826_v63 }
 0x213   :  { %v845_v24 = vsel %vm799_vm14, %v833_v5, 0.0 }
 0x214   :  { %v851_v43 = vadd.f32 %v845_v24, %v620_v1 }
 0x215   :  { %v822_v27 = vpop.permute.xlu1 %821 }
 0x216   :  { %v832_v47 = vsel %vm827_vm11, %v822_v27, %v824_v9  ;;  %v872_v49 = vadd.f32 %v1562_v57, %v851_v43 }
 0x217   :  { %v844_v44 = vsel %vm798_vm15, %v832_v47, 0.0 }
 0x218   :  { %v850_v32 = vadd.f32 %v844_v44, %v619_v55  ;;  %v878_v56 = vmax.f32 %v872_v49, 0.0 }
 0x21a   :  { %v884_v51 = vmin.f32 %v878_v56, 6.0  ;;  %v871_v54 = vadd.f32 %v1562_v57, %v850_v32  ;;  %v1033_v57 = vld [vmem:[%s1650_s0] sm:$0xff] }
 0x21c   :  { %900 = vmatprep.subr.mxu1 %v884_v51  ;;  %v877_v6 = vmax.f32 %v871_v54, 0.0 }
 0x21e   :  { %v883_v31 = vmin.f32 %v877_v6, 6.0 }
 0x220   :  { %901 = vmatpush1.msra.mxu1 %v883_v31 }
 0x221   :  { %988 = vmatmul.mubr.msk.f32.vlgmr.msra.gmra.mrb[0].mxu1 %vm892_vm0, %v885_v59 }
 0x222   :  { %v890_v4 = vpop.permute.xlu0 %889 }
 0x2f4   :  { %v962_v11 = vpop.f32.mrb[0].mxu1 }
 0x2f5   :  { %v963_v61 = vadd.f32 %v962_v11, %v890_v4  ;;  %v964_v62 = vpop.f32.mrb[1].mxu1 }
 0x2f6   :  { %v965_v60 = vadd.f32 %v964_v62, %v890_v4 }
 0x2f7   :  { %v967_v13 = vadd.f32 %v1033_v57, %v963_v61 }
 0x2f8   :  { %v968_v53 = vadd.f32 %v1034_v2, %v965_v60 }
 0x2f9   :  { %969 = vst [vmem:[#allocation3] sm:$0xff] %v967_v13 }
 0x2fa   :  { %970 = vst [vmem:[#allocation3 + $0x8] sm:$0xff] %v968_v53 }
 0x2fb   :  { %1046 = shalt.err (!%p1043_p4)
}
 0x2fc   :  { %s1047_s22 = scalar_lea.hbm %s1658_s8, 256 }
 0x2fd   :  { %p1048_p5 = scmp.ne.s32.totalorder %s1658_s8, %s1047_s22  ;;  %p1051_p6 = scmp.lt.u32.totalorder %s1047_s22, %s1658_s8 }
 0x2ff   :  { %p1053_p7 = pnand %p1051_p6, %p1048_p5 }
 0x301   :  { %1056 = shalt.err (!%p1053_p7)
}
 0x302   :  { %980 = dma.vmem_to_hbm [thread:$0]  %s978_s17, 256, %s1658_s8, [#allocation4]  }
 0x303   :  { %1057 = dma.done.wait [#allocation4], 256  }
 0x304   :  { %1058 = vsyncadd [#allocation4], 4294967040 }
 0x305   :  { %984 = vsyncpa [#allocation4], 1 }

</bundles_post_ra>
